<compile_context>
chip_gen: v6e
topology: v6e:2x2x1
jax: 0.10.0
libtpu: 0.0.40
codegen_flags: <defaults>
</compile_context>

<pallas_src>
import functools

import jax
import jax.numpy as jnp
import numpy as np
from jax import lax
from jax.experimental import pallas as pl
from jax.experimental.pallas import tpu as pltpu

BN_EPS = 1e-5
K = 9                 # conv1/conv2 kernel size
PAD = K // 2
CIN, C1, C2, C3 = 4, 32, 16, 3
CIN_PAD = 8           # conv1 im2col taps padded to 8 sublanes (tile alignment)


def _valid_mask(pos, s, L):
    # 1.0 where the shifted tap stays inside [0, L) ('same' zero padding).
    return ((pos + s >= 0) & (pos + s < L)).astype(jnp.float32)


# --------------------------- pass 1: conv1 + stats1 ---------------------------
def _conv1_stats_kernel(x_ref, w1_ref, h1_ref, sum_ref, ssq_ref, a_scr,
                        *, L, mxu_dtype):
    b = pl.program_id(0)

    @pl.when(b == 0)
    def _init():
        # Grid axis is sequential ("arbitrary"), so step 0 runs first.  Rows
        # 8t+4 .. 8t+7 of the im2col scratch stay zero forever (in-VMEM Cin
        # 4->8 zero padding; nothing padded in HBM).
        a_scr[...] = jnp.zeros_like(a_scr)
        sum_ref[...] = jnp.zeros_like(sum_ref)
        ssq_ref[...] = jnp.zeros_like(ssq_ref)

    x = x_ref[...]                                                # (4, L) f32
    pos = lax.broadcasted_iota(jnp.int32, (1, L), 1)

    # im2col: 9 shifted taps stacked along sublanes -> ONE MXU matmul.  Only
    # the 4 real input rows are rolled/masked.
    for t, s in enumerate(range(-PAD, PAD + 1)):
        if s == 0:
            tap = x
        else:
            tap = pltpu.roll(x, (-s) % L, axis=1) * _valid_mask(pos, s, L)
        a_scr[pl.ds(CIN_PAD * t, CIN), :] = tap                   # rows 8t..8t+3

    # conv1 (bias dropped: cancels in training-mode BN)
    h = jnp.dot(w1_ref[...], a_scr[...].astype(mxu_dtype),
                preferred_element_type=jnp.float32)               # (32, L) f32
    hb = h.astype(mxu_dtype)
    h1_ref[...] = hb                                              # bf16 spill

    # BN statistics in f32, from the exact (rounded) values normalized later.
    hf = hb.astype(jnp.float32)
    sum_ref[...] += jnp.sum(hf, axis=1, keepdims=True)
    ssq_ref[...] += jnp.sum(hf * hf, axis=1, keepdims=True)


# ---------------------- pass 2: BN1 + ReLU + conv2 + stats2 -------------------
def _bn1_conv2_stats_kernel(h1_ref, sc_ref, sh_ref, w2_ref,
                            h2_ref, sum_ref, ssq_ref, *, L, mxu_dtype):
    b = pl.program_id(0)

    @pl.when(b == 0)
    def _init():
        sum_ref[...] = jnp.zeros_like(sum_ref)
        ssq_ref[...] = jnp.zeros_like(ssq_ref)

    # BN1 folded into per-channel scale/shift (global batch stats) + ReLU.
    h = jnp.maximum(h1_ref[...].astype(jnp.float32) * sc_ref[...] + sh_ref[...],
                    0.0)                                          # (32, L) f32

    pos = lax.broadcasted_iota(jnp.int32, (1, L), 1)
    cols = []
    for s in range(-PAD, PAD + 1):
        if s == 0:
            tap = h
        else:
            tap = pltpu.roll(h, (-s) % L, axis=1) * _valid_mask(pos, s, L)
        cols.append(tap.astype(mxu_dtype))        # per-tap bf16 cast (small temp)
    a = jnp.concatenate(cols, axis=0)             # (288, L) bf16, 32-row pieces

    # conv2 (bias dropped: cancels in training-mode BN)
    y = jnp.dot(w2_ref[...], a, preferred_element_type=jnp.float32)   # (16, L)
    yb = y.astype(mxu_dtype)
    h2_ref[...] = yb                                              # bf16 spill
    yf = yb.astype(jnp.float32)
    sum_ref[...] += jnp.sum(yf, axis=1, keepdims=True)
    ssq_ref[...] += jnp.sum(yf * yf, axis=1, keepdims=True)


# -------------------------- pass 3: BN2 + ReLU + conv3 ------------------------
def _bn2_conv3_kernel(h2_ref, sc_ref, sh_ref, w3_ref, b3_ref, o_ref, *, mxu_dtype):
    h = jnp.maximum(h2_ref[...].astype(jnp.float32) * sc_ref[...] + sh_ref[...],
                    0.0)                                          # (16, L) f32
    o_ref[...] = (jnp.dot(w3_ref[...], h.astype(mxu_dtype),
                          preferred_element_type=jnp.float32)
                  + b3_ref[...])                                  # (3, L) f32


# ----------------------------------- wrapper ----------------------------------
def simple_cnn_forward(x, params, *, mxu_dtype=jnp.bfloat16):
    """x: (N, 4, L) float32 -> (N, 3, L) float32 (training-mode BatchNorm)."""
    N, cin, L = x.shape
    assert cin == CIN
    NL = N * L

    def im2col_weights(w, cin_pad=None):
        # PyTorch (Cout, Cin, K) -> (Cout, K*Cin), row order [tap, cin].
        cout, c, k = w.shape
        if cin_pad is not None and cin_pad != c:
            w = jnp.pad(w, ((0, 0), (0, cin_pad - c), (0, 0)))
            c = cin_pad
        return jnp.transpose(w, (0, 2, 1)).reshape(cout, k * c).astype(mxu_dtype)

    w1 = im2col_weights(params["w1"], CIN_PAD)          # (32, 72)  bf16
    w2 = im2col_weights(params["w2"])                   # (16, 288) bf16
    w3 = params["w3"][:, :, 0].astype(mxu_dtype)        # (3, 16)   bf16
    b3 = params["b3"].reshape(-1, 1)                    # (3, 1)    f32

    # 48 MiB keeps headroom on v7x's 64 MiB VMEM; the per-step footprint is
    # dominated by conv2's (288, L) bf16 im2col temp.
    vmem = 48 * 1024 * 1024
    cp_arb = pltpu.CompilerParams(dimension_semantics=("arbitrary",),
                                  vmem_limit_bytes=vmem)
    cp_par = pltpu.CompilerParams(dimension_semantics=("parallel",),
                                  vmem_limit_bytes=vmem)

    def full(shape):
        return pl.BlockSpec(shape, lambda b: (0,) * len(shape))

    def per_batch(c):
        return pl.BlockSpec((None, c, L), lambda b: (b, 0, 0))

    # ---- pass 1: conv1 + BN1 batch statistics -------------------------------
    h1, s1, q1 = pl.pallas_call(
        functools.partial(_conv1_stats_kernel, L=L, mxu_dtype=mxu_dtype),
        grid_spec=pltpu.PrefetchScalarGridSpec(
            num_scalar_prefetch=0, grid=(N,),
            in_specs=[per_batch(CIN), full((C1, K * CIN_PAD))],
            out_specs=[per_batch(C1), full((C1, 1)), full((C1, 1))],
            scratch_shapes=[pltpu.VMEM((K * CIN_PAD, L), jnp.float32)]),
        out_shape=(jax.ShapeDtypeStruct((N, C1, L), mxu_dtype),
                   jax.ShapeDtypeStruct((C1, 1), jnp.float32),
                   jax.ShapeDtypeStruct((C1, 1), jnp.float32)),
        compiler_params=cp_arb,
        cost_estimate=pl.CostEstimate(
            flops=2 * C1 * K * CIN_PAD * NL, transcendentals=0,
            bytes_accessed=4 * CIN * NL + 2 * C1 * K * CIN_PAD + 2 * C1 * NL),
    )(x, w1)

    # Fold training-mode BN into per-channel scale/shift (tiny (C,1) arrays).
    # TODO(synk): centered second-moment / Kahan accumulation for huge N*L.
    def fold_bn(s, q, gamma, beta):
        mean = s / NL
        var = q / NL - mean * mean
        scale = gamma.reshape(-1, 1) * lax.rsqrt(var + BN_EPS)
        shift = beta.reshape(-1, 1) - mean * scale
        return scale, shift

    sc1, sh1 = fold_bn(s1, q1, params["g1"], params["be1"])

    # ---- pass 2: BN1 + ReLU + conv2 + BN2 batch statistics ------------------
    h2, s2, q2 = pl.pallas_call(
        functools.partial(_bn1_conv2_stats_kernel, L=L, mxu_dtype=mxu_dtype),
        grid_spec=pltpu.PrefetchScalarGridSpec(
            num_scalar_prefetch=0, grid=(N,),
            in_specs=[per_batch(C1), full((C1, 1)), full((C1, 1)),
                      full((C2, K * C1))],
            out_specs=[per_batch(C2), full((C2, 1)), full((C2, 1))]),
        out_shape=(jax.ShapeDtypeStruct((N, C2, L), mxu_dtype),
                   jax.ShapeDtypeStruct((C2, 1), jnp.float32),
                   jax.ShapeDtypeStruct((C2, 1), jnp.float32)),
        compiler_params=cp_arb,
        cost_estimate=pl.CostEstimate(
            flops=2 * C2 * K * C1 * NL, transcendentals=0,
            bytes_accessed=2 * C1 * NL + 2 * C2 * K * C1 + 2 * C2 * NL),
    )(h1, sc1, sh1, w2)

    sc2, sh2 = fold_bn(s2, q2, params["g2"], params["be2"])

    # ---- pass 3: BN2 + ReLU + conv3 (k=1), written directly as (N, 3, L) ----
    out = pl.pallas_call(
        functools.partial(_bn2_conv3_kernel, mxu_dtype=mxu_dtype),
        grid_spec=pltpu.PrefetchScalarGridSpec(
            num_scalar_prefetch=0, grid=(N,),
            in_specs=[per_batch(C2), full((C2, 1)), full((C2, 1)),
                      full((C3, C2)), full((C3, 1))],
            out_specs=per_batch(C3)),
        out_shape=jax.ShapeDtypeStruct((N, C3, L), jnp.float32),
        compiler_params=cp_par,
        cost_estimate=pl.CostEstimate(
            flops=2 * C3 * C2 * NL, transcendentals=0,
            bytes_accessed=2 * C2 * NL + 2 * C3 * C2 + 4 * C3 * NL),
    )(h2, sc2, sh2, w3, b3)

    return out


# ---------------- pure-JAX reference (for correctness check) ----------------
def _conv1d_ref(x, w, b, pad):
    out = lax.conv_general_dilated(
        x, w, window_strides=(1,), padding=[(pad, pad)],
        dimension_numbers=("NCH", "OIH", "NCH"))
    return out + b[None, :, None]


def _bn_ref(x, gamma, beta):
    mean = jnp.mean(x, axis=(0, 2), keepdims=True)
    var = jnp.mean((x - mean) ** 2, axis=(0, 2), keepdims=True)
    return (x - mean) * gamma[None, :, None] * lax.rsqrt(var + BN_EPS) \
        + beta[None, :, None]


def simple_cnn_ref(x, p):
    h = jax.nn.relu(_bn_ref(_conv1d_ref(x, p["w1"], p["b1"], 4), p["g1"], p["be1"]))
    h = jax.nn.relu(_bn_ref(_conv1d_ref(h, p["w2"], p["b2"], 4), p["g2"], p["be2"]))
    return _conv1d_ref(h, p["w3"], p["b3"], 0)


if __name__ == "__main__":
    key = jax.random.PRNGKey(0)
    kx, k1, k2, k3, kb1, kb2, kb3 = jax.random.split(key, 7)

    N, Cin, L = 2, 4, 128
    x = jax.random.normal(kx, (N, Cin, L), dtype=jnp.float32)

    params = {
        # conv weights (PyTorch layout: (Cout, Cin, K)); deterministic init
        "w1": 0.1 * jax.random.normal(k1, (32, 4, 9), dtype=jnp.float32),
        "b1": 0.1 * jax.random.normal(kb1, (32,), dtype=jnp.float32),
        "w2": 0.1 * jax.random.normal(k2, (16, 32, 9), dtype=jnp.float32),
        "b2": 0.1 * jax.random.normal(kb2, (16,), dtype=jnp.float32),
        "w3": 0.1 * jax.random.normal(k3, (3, 16, 1), dtype=jnp.float32),
        "b3": 0.1 * jax.random.normal(kb3, (3,), dtype=jnp.float32),
        # BatchNorm affine params at PyTorch defaults (weight=1, bias=0)
        "g1": jnp.ones((32,), jnp.float32), "be1": jnp.zeros((32,), jnp.float32),
        "g2": jnp.ones((16,), jnp.float32), "be2": jnp.zeros((16,), jnp.float32),
    }

    out = jax.block_until_ready(simple_cnn_forward(x, params))
    assert out.shape == (N, 3, L), out.shape

    ref = jax.block_until_ready(simple_cnn_ref(x, params))
    # Tolerance reflects bf16 MXU operands AND bf16 HBM spill of the
    # inter-pass activations (stats are computed from the rounded values so
    # the normalization stays self-consistent); the reference is full f32.
    np.testing.assert_allclose(np.asarray(out), np.asarray(ref),
                               rtol=3e-2, atol=3e-2)

    print("KERNEL_OK")
</pallas_src>

<mosaic_0001>
module attributes {stable_mosaic.version = 11 : i64} {
  func.func @_conv1_stats_kernel(%arg0: i32, %arg1: memref<1x4x128xf32, #tpu.memory_space<vmem>>, %arg2: memref<32x72xbf16, #tpu.memory_space<vmem>>, %arg3: memref<1x32x128xbf16, #tpu.memory_space<vmem>>, %arg4: memref<32x1xf32, #tpu.memory_space<vmem>>, %arg5: memref<32x1xf32, #tpu.memory_space<vmem>>, %arg6: memref<72x128xf32, #tpu.memory_space<vmem>>) attributes {dimension_semantics = [#tpu.dimension_semantics<arbitrary>], iteration_bounds = array<i64: 2>, scalar_prefetch = 0 : i64, scratch_operands = 1 : i64, tpu.core_type = #tpu.core_type<tc>, window_params = [{transform_indices = @transform_0, window_bounds = array<i64: 1, 4, 128>}, {pipeline_mode = #tpu.pipeline_mode<synchronous>, transform_indices = @transform_1, window_bounds = array<i64: 32, 72>}, {transform_indices = @transform_2, window_bounds = array<i64: 1, 32, 128>}, {pipeline_mode = #tpu.pipeline_mode<synchronous>, transform_indices = @transform_3, window_bounds = array<i64: 32, 1>}, {pipeline_mode = #tpu.pipeline_mode<synchronous>, transform_indices = @transform_4, window_bounds = array<i64: 32, 1>}]} {
    %c0_i32 = arith.constant 0 : i32
    %0 = arith.cmpi eq, %arg0, %c0_i32 : i32
    %1 = arith.extui %0 : i1 to i32
    %c0_i32_0 = arith.constant 0 : i32
    %2 = arith.cmpi ne, %1, %c0_i32_0 : i32
    scf.if %2 {
      %cst_57 = arith.constant 0.000000e+00 : f32
      %147 = vector.broadcast %cst_57 : f32 to vector<72x128xf32>
      %c0_58 = arith.constant 0 : index
      %c0_59 = arith.constant 0 : index
      %148 = vector.load %arg6[%c0_58, %c0_59] : memref<72x128xf32, #tpu.memory_space<vmem>>, vector<72x128xf32>
      tpu.vector_store %arg6[%c0_58, %c0_59], %147 {strides = array<i32>} : memref<72x128xf32, #tpu.memory_space<vmem>>, vector<72x128xf32>,
      %cst_60 = arith.constant 0.000000e+00 : f32
      %149 = vector.broadcast %cst_60 : f32 to vector<32x1xf32>
      %c0_61 = arith.constant 0 : index
      %c0_62 = arith.constant 0 : index
      %150 = vector.load %arg4[%c0_61, %c0_62] : memref<32x1xf32, #tpu.memory_space<vmem>>, vector<32x1xf32>
      tpu.vector_store %arg4[%c0_61, %c0_62], %149 {strides = array<i32>} : memref<32x1xf32, #tpu.memory_space<vmem>>, vector<32x1xf32>,
      %cst_63 = arith.constant 0.000000e+00 : f32
      %151 = vector.broadcast %cst_63 : f32 to vector<32x1xf32>
      %c0_64 = arith.constant 0 : index
      %c0_65 = arith.constant 0 : index
      %152 = vector.load %arg5[%c0_64, %c0_65] : memref<32x1xf32, #tpu.memory_space<vmem>>, vector<32x1xf32>
      tpu.vector_store %arg5[%c0_64, %c0_65], %151 {strides = array<i32>} : memref<32x1xf32, #tpu.memory_space<vmem>>, vector<32x1xf32>,
    } else {
    }
    %c0 = arith.constant 0 : index
    %c0_1 = arith.constant 0 : index
    %c0_2 = arith.constant 0 : index
    %3 = vector.load %arg1[%c0, %c0_1, %c0_2] : memref<1x4x128xf32, #tpu.memory_space<vmem>>, vector<1x4x128xf32>
    %4 = vector.shape_cast %3 : vector<1x4x128xf32> to vector<4x128xf32>
    %5 = tpu.iota {dimensions = array<i32: 1>} : vector<1x128xi32>
    %c4_i32 = arith.constant 4 : i32
    %6 = tpu.dynamic_rotate %4 by %c4_i32 dim 1 : vector<4x128xf32>, i32 -> vector<4x128xf32>
    %c-4_i32 = arith.constant -4 : i32
    %7 = vector.broadcast %c-4_i32 : i32 to vector<1x128xi32>
    %8 = arith.addi %5, %7 : vector<1x128xi32>
    %c0_i32_3 = arith.constant 0 : i32
    %9 = vector.broadcast %c0_i32_3 : i32 to vector<1x128xi32>
    %10 = arith.cmpi sge, %8, %9 : vector<1x128xi32>
    %c-4_i32_4 = arith.constant -4 : i32
    %11 = vector.broadcast %c-4_i32_4 : i32 to vector<1x128xi32>
    %12 = arith.addi %5, %11 : vector<1x128xi32>
    %c128_i32 = arith.constant 128 : i32
    %13 = vector.broadcast %c128_i32 : i32 to vector<1x128xi32>
    %14 = arith.cmpi slt, %12, %13 : vector<1x128xi32>
    %15 = arith.andi %10, %14 : vector<1x128xi1>
    %16 = arith.extui %15 : vector<1x128xi1> to vector<1x128xi32>
    %17 = arith.sitofp %16 : vector<1x128xi32> to vector<1x128xf32>
    %18 = vector.broadcast %17 : vector<1x128xf32> to vector<4x128xf32>
    %19 = arith.mulf %6, %18 : vector<4x128xf32>
    %c0_5 = arith.constant 0 : index
    %c0_6 = arith.constant 0 : index
    %20 = vector.load %arg6[%c0_5, %c0_6] : memref<72x128xf32, #tpu.memory_space<vmem>>, vector<4x128xf32>
    tpu.vector_store %arg6[%c0_5, %c0_6], %19 {strides = array<i32>} : memref<72x128xf32, #tpu.memory_space<vmem>>, vector<4x128xf32>,
    %c3_i32 = arith.constant 3 : i32
    %21 = tpu.dynamic_rotate %4 by %c3_i32 dim 1 : vector<4x128xf32>, i32 -> vector<4x128xf32>
    %c-3_i32 = arith.constant -3 : i32
    %22 = vector.broadcast %c-3_i32 : i32 to vector<1x128xi32>
    %23 = arith.addi %5, %22 : vector<1x128xi32>
    %c0_i32_7 = arith.constant 0 : i32
    %24 = vector.broadcast %c0_i32_7 : i32 to vector<1x128xi32>
    %25 = arith.cmpi sge, %23, %24 : vector<1x128xi32>
    %c-3_i32_8 = arith.constant -3 : i32
    %26 = vector.broadcast %c-3_i32_8 : i32 to vector<1x128xi32>
    %27 = arith.addi %5, %26 : vector<1x128xi32>
    %c128_i32_9 = arith.constant 128 : i32
    %28 = vector.broadcast %c128_i32_9 : i32 to vector<1x128xi32>
    %29 = arith.cmpi slt, %27, %28 : vector<1x128xi32>
    %30 = arith.andi %25, %29 : vector<1x128xi1>
    %31 = arith.extui %30 : vector<1x128xi1> to vector<1x128xi32>
    %32 = arith.sitofp %31 : vector<1x128xi32> to vector<1x128xf32>
    %33 = vector.broadcast %32 : vector<1x128xf32> to vector<4x128xf32>
    %34 = arith.mulf %21, %33 : vector<4x128xf32>
    %c8 = arith.constant 8 : index
    %c0_10 = arith.constant 0 : index
    %35 = vector.load %arg6[%c8, %c0_10] : memref<72x128xf32, #tpu.memory_space<vmem>>, vector<4x128xf32>
    tpu.vector_store %arg6[%c8, %c0_10], %34 {strides = array<i32>} : memref<72x128xf32, #tpu.memory_space<vmem>>, vector<4x128xf32>,
    %c2_i32 = arith.constant 2 : i32
    %36 = tpu.dynamic_rotate %4 by %c2_i32 dim 1 : vector<4x128xf32>, i32 -> vector<4x128xf32>
    %c-2_i32 = arith.constant -2 : i32
    %37 = vector.broadcast %c-2_i32 : i32 to vector<1x128xi32>
    %38 = arith.addi %5, %37 : vector<1x128xi32>
    %c0_i32_11 = arith.constant 0 : i32
    %39 = vector.broadcast %c0_i32_11 : i32 to vector<1x128xi32>
    %40 = arith.cmpi sge, %38, %39 : vector<1x128xi32>
    %c-2_i32_12 = arith.constant -2 : i32
    %41 = vector.broadcast %c-2_i32_12 : i32 to vector<1x128xi32>
    %42 = arith.addi %5, %41 : vector<1x128xi32>
    %c128_i32_13 = arith.constant 128 : i32
    %43 = vector.broadcast %c128_i32_13 : i32 to vector<1x128xi32>
    %44 = arith.cmpi slt, %42, %43 : vector<1x128xi32>
    %45 = arith.andi %40, %44 : vector<1x128xi1>
    %46 = arith.extui %45 : vector<1x128xi1> to vector<1x128xi32>
    %47 = arith.sitofp %46 : vector<1x128xi32> to vector<1x128xf32>
    %48 = vector.broadcast %47 : vector<1x128xf32> to vector<4x128xf32>
    %49 = arith.mulf %36, %48 : vector<4x128xf32>
    %c16 = arith.constant 16 : index
    %c0_14 = arith.constant 0 : index
    %50 = vector.load %arg6[%c16, %c0_14] : memref<72x128xf32, #tpu.memory_space<vmem>>, vector<4x128xf32>
    tpu.vector_store %arg6[%c16, %c0_14], %49 {strides = array<i32>} : memref<72x128xf32, #tpu.memory_space<vmem>>, vector<4x128xf32>,
    %c1_i32 = arith.constant 1 : i32
    %51 = tpu.dynamic_rotate %4 by %c1_i32 dim 1 : vector<4x128xf32>, i32 -> vector<4x128xf32>
    %c-1_i32 = arith.constant -1 : i32
    %52 = vector.broadcast %c-1_i32 : i32 to vector<1x128xi32>
    %53 = arith.addi %5, %52 : vector<1x128xi32>
    %c0_i32_15 = arith.constant 0 : i32
    %54 = vector.broadcast %c0_i32_15 : i32 to vector<1x128xi32>
    %55 = arith.cmpi sge, %53, %54 : vector<1x128xi32>
    %c-1_i32_16 = arith.constant -1 : i32
    %56 = vector.broadcast %c-1_i32_16 : i32 to vector<1x128xi32>
    %57 = arith.addi %5, %56 : vector<1x128xi32>
    %c128_i32_17 = arith.constant 128 : i32
    %58 = vector.broadcast %c128_i32_17 : i32 to vector<1x128xi32>
    %59 = arith.cmpi slt, %57, %58 : vector<1x128xi32>
    %60 = arith.andi %55, %59 : vector<1x128xi1>
    %61 = arith.extui %60 : vector<1x128xi1> to vector<1x128xi32>
    %62 = arith.sitofp %61 : vector<1x128xi32> to vector<1x128xf32>
    %63 = vector.broadcast %62 : vector<1x128xf32> to vector<4x128xf32>
    %64 = arith.mulf %51, %63 : vector<4x128xf32>
    %c24 = arith.constant 24 : index
    %c0_18 = arith.constant 0 : index
    %65 = vector.load %arg6[%c24, %c0_18] : memref<72x128xf32, #tpu.memory_space<vmem>>, vector<4x128xf32>
    tpu.vector_store %arg6[%c24, %c0_18], %64 {strides = array<i32>} : memref<72x128xf32, #tpu.memory_space<vmem>>, vector<4x128xf32>,
    %c32 = arith.constant 32 : index
    %c0_19 = arith.constant 0 : index
    %66 = vector.load %arg6[%c32, %c0_19] : memref<72x128xf32, #tpu.memory_space<vmem>>, vector<4x128xf32>
    tpu.vector_store %arg6[%c32, %c0_19], %4 {strides = array<i32>} : memref<72x128xf32, #tpu.memory_space<vmem>>, vector<4x128xf32>,
    %c127_i32 = arith.constant 127 : i32
    %67 = tpu.dynamic_rotate %4 by %c127_i32 dim 1 : vector<4x128xf32>, i32 -> vector<4x128xf32>
    %c1_i32_20 = arith.constant 1 : i32
    %68 = vector.broadcast %c1_i32_20 : i32 to vector<1x128xi32>
    %69 = arith.addi %5, %68 : vector<1x128xi32>
    %c0_i32_21 = arith.constant 0 : i32
    %70 = vector.broadcast %c0_i32_21 : i32 to vector<1x128xi32>
    %71 = arith.cmpi sge, %69, %70 : vector<1x128xi32>
    %c1_i32_22 = arith.constant 1 : i32
    %72 = vector.broadcast %c1_i32_22 : i32 to vector<1x128xi32>
    %73 = arith.addi %5, %72 : vector<1x128xi32>
    %c128_i32_23 = arith.constant 128 : i32
    %74 = vector.broadcast %c128_i32_23 : i32 to vector<1x128xi32>
    %75 = arith.cmpi slt, %73, %74 : vector<1x128xi32>
    %76 = arith.andi %71, %75 : vector<1x128xi1>
    %77 = arith.extui %76 : vector<1x128xi1> to vector<1x128xi32>
    %78 = arith.sitofp %77 : vector<1x128xi32> to vector<1x128xf32>
    %79 = vector.broadcast %78 : vector<1x128xf32> to vector<4x128xf32>
    %80 = arith.mulf %67, %79 : vector<4x128xf32>
    %c40 = arith.constant 40 : index
    %c0_24 = arith.constant 0 : index
    %81 = vector.load %arg6[%c40, %c0_24] : memref<72x128xf32, #tpu.memory_space<vmem>>, vector<4x128xf32>
    tpu.vector_store %arg6[%c40, %c0_24], %80 {strides = array<i32>} : memref<72x128xf32, #tpu.memory_space<vmem>>, vector<4x128xf32>,
    %c126_i32 = arith.constant 126 : i32
    %82 = tpu.dynamic_rotate %4 by %c126_i32 dim 1 : vector<4x128xf32>, i32 -> vector<4x128xf32>
    %c2_i32_25 = arith.constant 2 : i32
    %83 = vector.broadcast %c2_i32_25 : i32 to vector<1x128xi32>
    %84 = arith.addi %5, %83 : vector<1x128xi32>
    %c0_i32_26 = arith.constant 0 : i32
    %85 = vector.broadcast %c0_i32_26 : i32 to vector<1x128xi32>
    %86 = arith.cmpi sge, %84, %85 : vector<1x128xi32>
    %c2_i32_27 = arith.constant 2 : i32
    %87 = vector.broadcast %c2_i32_27 : i32 to vector<1x128xi32>
    %88 = arith.addi %5, %87 : vector<1x128xi32>
    %c128_i32_28 = arith.constant 128 : i32
    %89 = vector.broadcast %c128_i32_28 : i32 to vector<1x128xi32>
    %90 = arith.cmpi slt, %88, %89 : vector<1x128xi32>
    %91 = arith.andi %86, %90 : vector<1x128xi1>
    %92 = arith.extui %91 : vector<1x128xi1> to vector<1x128xi32>
    %93 = arith.sitofp %92 : vector<1x128xi32> to vector<1x128xf32>
    %94 = vector.broadcast %93 : vector<1x128xf32> to vector<4x128xf32>
    %95 = arith.mulf %82, %94 : vector<4x128xf32>
    %c48 = arith.constant 48 : index
    %c0_29 = arith.constant 0 : index
    %96 = vector.load %arg6[%c48, %c0_29] : memref<72x128xf32, #tpu.memory_space<vmem>>, vector<4x128xf32>
    tpu.vector_store %arg6[%c48, %c0_29], %95 {strides = array<i32>} : memref<72x128xf32, #tpu.memory_space<vmem>>, vector<4x128xf32>,
    %c125_i32 = arith.constant 125 : i32
    %97 = tpu.dynamic_rotate %4 by %c125_i32 dim 1 : vector<4x128xf32>, i32 -> vector<4x128xf32>
    %c3_i32_30 = arith.constant 3 : i32
    %98 = vector.broadcast %c3_i32_30 : i32 to vector<1x128xi32>
    %99 = arith.addi %5, %98 : vector<1x128xi32>
    %c0_i32_31 = arith.constant 0 : i32
    %100 = vector.broadcast %c0_i32_31 : i32 to vector<1x128xi32>
    %101 = arith.cmpi sge, %99, %100 : vector<1x128xi32>
    %c3_i32_32 = arith.constant 3 : i32
    %102 = vector.broadcast %c3_i32_32 : i32 to vector<1x128xi32>
    %103 = arith.addi %5, %102 : vector<1x128xi32>
    %c128_i32_33 = arith.constant 128 : i32
    %104 = vector.broadcast %c128_i32_33 : i32 to vector<1x128xi32>
    %105 = arith.cmpi slt, %103, %104 : vector<1x128xi32>
    %106 = arith.andi %101, %105 : vector<1x128xi1>
    %107 = arith.extui %106 : vector<1x128xi1> to vector<1x128xi32>
    %108 = arith.sitofp %107 : vector<1x128xi32> to vector<1x128xf32>
    %109 = vector.broadcast %108 : vector<1x128xf32> to vector<4x128xf32>
    %110 = arith.mulf %97, %109 : vector<4x128xf32>
    %c56 = arith.constant 56 : index
    %c0_34 = arith.constant 0 : index
    %111 = vector.load %arg6[%c56, %c0_34] : memref<72x128xf32, #tpu.memory_space<vmem>>, vector<4x128xf32>
    tpu.vector_store %arg6[%c56, %c0_34], %110 {strides = array<i32>} : memref<72x128xf32, #tpu.memory_space<vmem>>, vector<4x128xf32>,
    %c124_i32 = arith.constant 124 : i32
    %112 = tpu.dynamic_rotate %4 by %c124_i32 dim 1 : vector<4x128xf32>, i32 -> vector<4x128xf32>
    %c4_i32_35 = arith.constant 4 : i32
    %113 = vector.broadcast %c4_i32_35 : i32 to vector<1x128xi32>
    %114 = arith.addi %5, %113 : vector<1x128xi32>
    %c0_i32_36 = arith.constant 0 : i32
    %115 = vector.broadcast %c0_i32_36 : i32 to vector<1x128xi32>
    %116 = arith.cmpi sge, %114, %115 : vector<1x128xi32>
    %c4_i32_37 = arith.constant 4 : i32
    %117 = vector.broadcast %c4_i32_37 : i32 to vector<1x128xi32>
    %118 = arith.addi %5, %117 : vector<1x128xi32>
    %c128_i32_38 = arith.constant 128 : i32
    %119 = vector.broadcast %c128_i32_38 : i32 to vector<1x128xi32>
    %120 = arith.cmpi slt, %118, %119 : vector<1x128xi32>
    %121 = arith.andi %116, %120 : vector<1x128xi1>
    %122 = arith.extui %121 : vector<1x128xi1> to vector<1x128xi32>
    %123 = arith.sitofp %122 : vector<1x128xi32> to vector<1x128xf32>
    %124 = vector.broadcast %123 : vector<1x128xf32> to vector<4x128xf32>
    %125 = arith.mulf %112, %124 : vector<4x128xf32>
    %c64 = arith.constant 64 : index
    %c0_39 = arith.constant 0 : index
    %126 = vector.load %arg6[%c64, %c0_39] : memref<72x128xf32, #tpu.memory_space<vmem>>, vector<4x128xf32>
    tpu.vector_store %arg6[%c64, %c0_39], %125 {strides = array<i32>} : memref<72x128xf32, #tpu.memory_space<vmem>>, vector<4x128xf32>,
    %c0_40 = arith.constant 0 : index
    %c0_41 = arith.constant 0 : index
    %127 = vector.load %arg2[%c0_40, %c0_41] : memref<32x72xbf16, #tpu.memory_space<vmem>>, vector<32x72xbf16>
    %c0_42 = arith.constant 0 : index
    %c0_43 = arith.constant 0 : index
    %128 = vector.load %arg6[%c0_42, %c0_43] : memref<72x128xf32, #tpu.memory_space<vmem>>, vector<72x128xf32>
    %129 = arith.truncf %128 : vector<72x128xf32> to vector<72x128xbf16>
    %cst = arith.constant dense<0.000000e+00> : vector<32x128xf32>
    %130 = tpu.matmul %127, %129, %cst {dimension_numbers = #tpu.dot_dimension_numbers<[1], [0], [0], [1], [0, 0, 1, 1], [], []>} : vector<32x72xbf16>, vector<72x128xbf16>, vector<32x128xf32> -> vector<32x128xf32>
    %131 = arith.truncf %130 : vector<32x128xf32> to vector<32x128xbf16>
    %c0_44 = arith.constant 0 : index
    %c0_45 = arith.constant 0 : index
    %c0_46 = arith.constant 0 : index
    %132 = vector.load %arg3[%c0_44, %c0_45, %c0_46] : memref<1x32x128xbf16, #tpu.memory_space<vmem>>, vector<1x32x128xbf16>
    %133 = vector.shape_cast %132 : vector<1x32x128xbf16> to vector<32x128xbf16>
    %134 = vector.shape_cast %131 : vector<32x128xbf16> to vector<1x32x128xbf16>
    tpu.vector_store %arg3[%c0_44, %c0_45, %c0_46], %134 {strides = array<i32>} : memref<1x32x128xbf16, #tpu.memory_space<vmem>>, vector<1x32x128xbf16>,
    %135 = arith.extf %131 : vector<32x128xbf16> to vector<32x128xf32>
    %c0_47 = arith.constant 0 : index
    %c0_48 = arith.constant 0 : index
    %136 = vector.load %arg4[%c0_47, %c0_48] : memref<32x1xf32, #tpu.memory_space<vmem>>, vector<32x1xf32>
    %cst_49 = arith.constant dense<0.000000e+00> : vector<32xf32>
    %137 = vector.multi_reduction <add>, %135, %cst_49 [1] : vector<32x128xf32> to vector<32xf32>
    %138 = vector.shape_cast %137 : vector<32xf32> to vector<32x1xf32>
    %139 = arith.addf %136, %138 : vector<32x1xf32>
    %c0_50 = arith.constant 0 : index
    %c0_51 = arith.constant 0 : index
    %140 = vector.load %arg4[%c0_50, %c0_51] : memref<32x1xf32, #tpu.memory_space<vmem>>, vector<32x1xf32>
    tpu.vector_store %arg4[%c0_50, %c0_51], %139 {strides = array<i32>} : memref<32x1xf32, #tpu.memory_space<vmem>>, vector<32x1xf32>,
    %c0_52 = arith.constant 0 : index
    %c0_53 = arith.constant 0 : index
    %141 = vector.load %arg5[%c0_52, %c0_53] : memref<32x1xf32, #tpu.memory_space<vmem>>, vector<32x1xf32>
    %142 = arith.mulf %135, %135 : vector<32x128xf32>
    %cst_54 = arith.constant dense<0.000000e+00> : vector<32xf32>
    %143 = vector.multi_reduction <add>, %142, %cst_54 [1] : vector<32x128xf32> to vector<32xf32>
    %144 = vector.shape_cast %143 : vector<32xf32> to vector<32x1xf32>
    %145 = arith.addf %141, %144 : vector<32x1xf32>
    %c0_55 = arith.constant 0 : index
    %c0_56 = arith.constant 0 : index
    %146 = vector.load %arg5[%c0_55, %c0_56] : memref<32x1xf32, #tpu.memory_space<vmem>>, vector<32x1xf32>
    tpu.vector_store %arg5[%c0_55, %c0_56], %145 {strides = array<i32>} : memref<32x1xf32, #tpu.memory_space<vmem>>, vector<32x1xf32>,
    return
  }
  func.func @transform_0(%arg0: i32) -> (i32, i32, i32) {
    %c0_i32 = arith.constant 0 : i32
    %c0_i32_0 = arith.constant 0 : i32
    %c0_i32_1 = arith.constant 0 : i32
    return %arg0, %c0_i32, %c0_i32_0 : i32, i32, i32
  }
  func.func @transform_1(%arg0: i32) -> (i32, i32) {
    %c0_i32 = arith.constant 0 : i32
    %c0_i32_0 = arith.constant 0 : i32
    %c0_i32_1 = arith.constant 0 : i32
    return %c0_i32, %c0_i32_0 : i32, i32
  }
  func.func @transform_2(%arg0: i32) -> (i32, i32, i32) {
    %c0_i32 = arith.constant 0 : i32
    %c0_i32_0 = arith.constant 0 : i32
    %c0_i32_1 = arith.constant 0 : i32
    return %arg0, %c0_i32, %c0_i32_0 : i32, i32, i32
  }
  func.func @transform_3(%arg0: i32) -> (i32, i32) {
    %c0_i32 = arith.constant 0 : i32
    %c0_i32_0 = arith.constant 0 : i32
    %c0_i32_1 = arith.constant 0 : i32
    return %c0_i32, %c0_i32_0 : i32, i32
  }
  func.func @transform_4(%arg0: i32) -> (i32, i32) {
    %c0_i32 = arith.constant 0 : i32
    %c0_i32_0 = arith.constant 0 : i32
    %c0_i32_1 = arith.constant 0 : i32
    return %c0_i32, %c0_i32_0 : i32, i32
  }
}

</mosaic_0001>

<bundles_post_ra>
// kernel: tpu_custom_call.1
= control target key start
LH: loop header
LB: loop body
LE: loop exit
PB: predicated region body
PF: predicated region fallthrough
CT: control target
= control target key end

     0   :  { %10 = vsyncpa [#allocation4], 0  ;;  %s1172_s0 = inlined_call_operand.hbm [shape: f32[2,4,128], index: 0, kind: input, shape index: {}]   ;;  %s1173_s1 = inlined_call_operand.hbm [shape: bf16[32,72], index: 1, kind: input, shape index: {}]   ;;  %s1174_s2 = inlined_call_operand.hbm [shape: bf16[2,32,128], index: 2, kind: output, shape index: {0}]   ;;  %s1175_s3 = inlined_call_operand.vmem [shape: f32[32,1], index: 3, kind: output, shape index: {1}]   ;;  %s1176_s4 = inlined_call_operand.vmem [shape: f32[32,1], index: 4, kind: output, shape index: {2}]  }
   0x1   :  { %12 = vsyncpa [#allocation4 + $0x1], 0 }
   0x2   :  { %13 = vsyncpa [#allocation7], 0 }
   0x3   :  { %14 = vsyncpa [#allocation5], 0 }
   0x4   :  { %16 = vsyncpa [#allocation5 + $0x1], 0  ;;  %s903_s15 = smov 0   ;;  %s905_s16 = smov 0  }
   0x5   :  { %s907_s17 = smov 0   ;;  %s909_s18 = smov 0  }
   0x6 LB: > { %s924_s19 = sadd.s32 4294967295, %s860_s18   ;;  %s596_s20 = sadd.s32 4294967294, %s860_s18   ;;  %s860_s18 = sphi %s909_s18, %s1199_s18   ;;  %s856_s17 = sphi %s907_s17, %s1198_s17   ;;  %s852_s16 = sphi %s905_s16, %s1197_s16   ;;  %s848_s15 = sphi %s903_s15, %s1196_s15  }
   0x7   : > { %p42_p0 = scmp.ne.s32.totalorder %s852_s16, %s848_s15  ;;  %p1177_p1 = scmp.eq.s32.totalorder %s924_s19, 0 }
   0x8   : > { %p93_p3 = scmp.eq.s32.totalorder %s596_s20, 1  ;;  %p597_p5 = scmp.ge.s32.totalorder %s860_s18, 1 }
   0x9   : > { %p933_p4 = por %p1177_p1, %p42_p0  ;;  %p142_p7 = scmp.lt.s32.totalorder %s860_s18, 3 }
   0xa   : > { %p938_p6 = por %p93_p3, %p42_p0  ;;  %s862_s24 = smov [#allocation6]  }
   0xb   : > { %s1181_s21 = scalar_select %p933_p4, 1, 0 }
   0xc   : > { %s1182_s22 = scalar_select %p938_p6, 1, 0 }
   0xd   : > { %p944_p9 = pnand %p597_p5, %p142_p7  ;;  %s154_s25 = sshll.u32 %s862_s24, 4  ;;  %s155_s25 = int_to_ptr.vmem [resolvable:$true] %s154_s25 }
   0xe   : > { %s958_s27 = sadd.s32 1, %s860_s18   ;;  %s29_s28 = sadd.s32 1, %s856_s17 }
   0xf   : > { %s1183_s23 = scalar_select %p944_p9, 1, 0 }
  0x10   : > { %p674_p10 = pneg %p944_p9  ;;  %s26_s29 = ssub.s32 %s860_s18, %s958_s27 }
  0x11   : > { %s749_s30 = scalar_lea.vmem %s155_s25, 256  ;;  %p757_p7 = scmp.lt.s32.totalorder %s155_s25, %s155_s25 }
  0x12   : > { %p953_p12 = pnand %p674_p10, %p1177_p1  ;;  %p750_p0 = scmp.ne.s32.totalorder %s155_s25, %s749_s30 }
  0x13   : > { %p758_p8 = scmp.lt.s32.totalorder %s749_s30, %s749_s30 }
  0x14   : > { %p740_p13 = pneg %p953_p12 }
  0x15   : > { %p759_p11 = por %p758_p8, %p757_p7 }
  0x16   : > { %p752_p3 = pnand %p750_p0, %p740_p13 }
  0x18   : > { %p753_p5 = pneg %p752_p3 }
  0x1a   : > { %p760_p2 = pnand %p759_p11, %p753_p5 }
  0x1c   : > { %763 = shalt.err (!%p760_p2)
}
  0x1d   : > { %s863_s5 = smov 64   ;;  %s864_s6 = smov 4  }
  0x1e   : > { %677 = dma.hbm_to_vmem [thread:$0]  (!%p953_p12), %s1173_s1, 256, %s155_s25, [#allocation7], %s863_s5, %s863_s5, %s864_s6  }
  0x1f   : > { %p27_p10 = scmp.eq.s32.totalorder %s26_s29, 0  ;;  %p36_p8 = scmp.ne.s32.totalorder %s856_s17, %s852_s16 }
  0x20   : > { %p37_p11 = scmp.eq.s32.totalorder %s860_s18, 0  ;;  %p687_p2 = scmp.lt.s32.totalorder %s860_s18, 2 }
  0x21   : > { %s975_s9 = scalar_select %p27_p10, %s856_s17, %s29_s28  }
  0x22   : > { %p38_p13 = por %p37_p11, %p36_p8  ;;  %p1185_p0 = scmp.eq.s32.totalorder %s924_s19, 1 }
  0x23   : > { %s168_s11 = sand.u32 1, %s856_s17   ;;  %s601_s12 = sshll.u32 %s860_s18, 6 }
  0x24   : > { %p979_p3 = por %p1185_p0, %p36_p8  ;;  %s600_s13 = sshll.u32 %s168_s11, 2 }
  0x25   : > { %s988_s24 = scalar_lea.hbm %s1172_s0, %s601_s12  ;;  %s172_s25 = scalar_lea.vmem [#allocation3], %s600_s13 }
  0x26   : > { %s1186_s10 = scalar_select %p979_p3, 1, 0 }
  0x27   : > { %s179_s26 = sshll.u32 %s172_s25, 4  ;;  %p990_p12 = pnand %p687_p2, %p38_p13  ;;  %s180_s26 = int_to_ptr.vmem [resolvable:$true] %s179_s26 }
  0x28   : > { %s169_s29 = scalar_lea.sflag [#allocation4], %s168_s11  ;;  %s764_s30 = scalar_lea.hbm %s988_s24, 64 }
  0x29   : > { %p765_p5 = scmp.ne.s32.totalorder %s988_s24, %s764_s30  ;;  %p766_p7 = pneg %p990_p12 }
  0x2a   : > { %s769_s7 = scalar_lea.hbm %s1172_s0, 128  ;;  %p770_p11 = scmp.lt.s32.totalorder %s988_s24, %s1172_s0 }
  0x2b   : > { %p767_p10 = pnand %p766_p7, %p765_p5  ;;  %p771_p2 = scmp.lt.s32.totalorder %s769_s7, %s764_s30 }
  0x2d   : > { %p768_p8 = pneg %p767_p10  ;;  %p772_p13 = por %p771_p2, %p770_p11 }
  0x2f   : > { %p773_p0 = pnand %p772_p13, %p768_p8 }
  0x31   : > { %776 = shalt.err (!%p773_p0)
}
  0x32   : > { %s777_s13 = scalar_lea.vmem %s180_s26, 64  ;;  %s865_s11 = smov [#allocation3]  }
  0x33   : > { %p778_p1 = scmp.ne.s32.totalorder %s180_s26, %s777_s13  ;;  %s782_s14 = sshll.u32 %s865_s11, 4  ;;  %s783_s14 = int_to_ptr.vmem [resolvable:$false] %s782_s14 }
  0x34   : > { %s784_s20 = scalar_lea.vmem %s783_s14, 128  ;;  %p785_p5 = scmp.lt.s32.totalorder %s180_s26, %s783_s14 }
  0x35   : > { %p780_p6 = pnand %p778_p1, %p766_p7  ;;  %p786_p10 = scmp.lt.s32.totalorder %s784_s20, %s777_s13 }
  0x37   : > { %p781_p3 = pneg %p780_p6  ;;  %p787_p4 = por %p786_p10, %p785_p5 }
  0x39   : > { %p788_p9 = pnand %p787_p4, %p781_p3 }
  0x3b   : > { %791 = shalt.err (!%p788_p9)
}
  0x3c   : > { %681 = dma.hbm_to_vmem [thread:$0]  (!%p990_p12), %s988_s24, 64, %s180_s26, %s169_s29  }
  0x3d   : > { %p1188_p8 = scmp.ne.s32.totalorder %s1183_s23, 0 }
  0x3e   : > { %s1011_s25 = sand.u32 (!%p1188_p8), 1, %s852_s16   ;;  %p1189_p1 = scmp.ne.s32.totalorder (!%p1188_p8), %s1181_s21, 0 }
  0x3f   : > { %188 = sbr.rel (%p1188_p8) target bundleno = 595 (0x253), region = 28  ;;  %s603_s30 = sshll.u32 (!%p1188_p8), %s1011_s25, 2 }
  0x40   : > { %s191_s5 = scalar_lea.sflag (!%p1188_p8), [#allocation4], %s1011_s25  ;;  %s194_s6 = scalar_lea.vmem (!%p1188_p8), [#allocation3], %s603_s30 }
  0x44   : > { %835 = dma.done.wait (%p1189_p1), %s191_s5, 64  }
  0x45   : > { %837 = vsyncadd (%p1189_p1), %s191_s5, 4294967232  ;;  %p1190_p4 = scmp.eq.s32.totalorder %s924_s19, 0 }
  0x47   : > { %839 = dma.done.wait (%p1190_p4), [#allocation7], 256   ;;  %p1191_p6 = pmov %p1190_p4 }
  0x48   : > { %s605_s23 = sshll.u32 %s1011_s25, 4  ;;  %p1192_p9 = scmp.ne.s32.totalorder %s924_s19, 0 }
  0x49   : > { %841 = vsyncadd (%p1191_p6), [#allocation7], 4294967040  ;;  %s1024_s24 = scalar_lea.vmem [#allocation8], %s605_s23 }
  0x4a   : > { %227 = sbr.rel (%p1192_p9) target bundleno = 89 (0x59), region = 40 }
  0x4f   : > { %vm237_vm0 = vcmask 7168   ;;  %v866_v0 = vmov 0.0  }
  0x50   : > { %228 = vst [vmem:[#allocation2 + $0x30] sm:$0xff] %v866_v0  ;;  %229 = vst [vmem:[#allocation2] sm:$0xff] %v866_v0 }
  0x51   : > { %230 = vst [vmem:[#allocation2 + $0x18] sm:$0xff] %v866_v0  ;;  %231 = vst [vmem:[#allocation2 + $0x10] sm:$0xff] %v866_v0 }
  0x52   : > { %232 = vst [vmem:[#allocation2 + $0x20] sm:$0xff] %v866_v0  ;;  %233 = vst [vmem:[#allocation2 + $0x28] sm:$0xff] %v866_v0 }
  0x53   : > { %234 = vst [vmem:[#allocation2 + $0x40] sm:$0xff] %v866_v0  ;;  %235 = vst [vmem:[#allocation2 + $0x38] sm:$0xff] %v866_v0 }
  0x54   : > { %236 = vst [vmem:[#allocation2 + $0x8] sm:$0xff] %v866_v0  ;;  %238 = vst.msk [vmem:[%s1175_s3] sm:$0xff] %vm237_vm0, %v866_v0 }
  0x55   : > { %239 = vst.msk [vmem:[%s1175_s3 + $0x8] sm:$0xff] %vm237_vm0, %v866_v0  ;;  %240 = vst.msk [vmem:[%s1175_s3 + $0x10] sm:$0xff] %vm237_vm0, %v866_v0 }
  0x56   : > { %241 = vst.msk [vmem:[%s1175_s3 + $0x18] sm:$0xff] %vm237_vm0, %v866_v0  ;;  %242 = vst.msk [vmem:[%s1176_s4] sm:$0xff] %vm237_vm0, %v866_v0 }
  0x57   : > { %243 = vst.msk [vmem:[%s1176_s4 + $0x8] sm:$0xff] %vm237_vm0, %v866_v0  ;;  %244 = vst.msk [vmem:[%s1176_s4 + $0x10] sm:$0xff] %vm237_vm0, %v866_v0 }
  0x58   : > { %245 = vst.msk [vmem:[%s1176_s4 + $0x18] sm:$0xff] %vm237_vm0, %v866_v0 }
  0x59 PF: > { %v246_v1 = vld [vmem:[%s194_s6] sm:$0xf]  ;;  %s867_s28 = smov 124   ;;  %s868_s29 = smov 125   ;;  %v736_v2 = vld [vmem:[#allocation6] sm:$0xff]   ;;  %vm358_vm1 = vcmask 588800   ;;  %v247_v3 = vlaneseq }
  0x5a   : > { %320 = vrot.lane.b32.xlu0 %v246_v1, %s867_s28  ;;  %289 = vst [vmem:[#allocation2 + $0x20] sm:$0xf] %v246_v1  ;;  %310 = vrot.lane.b32.xlu1 %v246_v1, %s868_s29  ;;  %s869_s7 = smov 126   ;;  %s870_s8 = smov 127   ;;  %v875_v9 = vmov 0.0   ;;  %vm365_vm10 = vcmask 1043456  }
  0x5b   : > { %s871_s12 = smov 1   ;;  %s872_s13 = smov 2   ;;  %661 = vmatprep.mubr.msk.bf16.mxu0 %vm358_vm1, %v736_v2  ;;  %v248_v4 = vand.u32 127, %v247_v3  ;;  %v737_v53 = vld [vmem:[#allocation6 + $0x8] sm:$0xff]  }
  0x5c   : > { %s873_s11 = smov 3   ;;  %s874_s14 = smov 4  }
  0x5d   : > { %v322_v5 = vadd.s32 4, %v248_v4  ;;  %v312_v6 = vadd.s32 3, %v248_v4  ;;  %v302_v7 = vadd.s32 2, %v248_v4  ;;  %v292_v8 = vadd.s32 1, %v248_v4  ;;  %s632_s6 = sshll.u32 %s924_s19, 8  ;;  %s501_s20 = sshll.u32 %s1024_s24, 4  ;;  %s1072_s20 = int_to_ptr.vmem [resolvable:$true] %s501_s20 }
  0x5e   : > { %300 = vrot.lane.b32.xlu0 %v246_v1, %s869_s7  ;;  %290 = vrot.lane.b32.xlu1 %v246_v1, %s870_s8  ;;  %v281_v12 = vadd.s32 4294967295, %v248_v4  ;;  %v271_v13 = vadd.s32 4294967294, %v248_v4  ;;  %v261_v20 = vadd.s32 4294967293, %v248_v4  ;;  %v251_v21 = vadd.s32 4294967292, %v248_v4  ;;  %s1070_s23 = scalar_lea.hbm %s1174_s2, %s632_s6  ;;  %s488_s21 = scalar_lea.sflag [#allocation5], %s1011_s25 }
  0x5f   : > { %vm324_vm2 = vcmp.lt.s32.totalorder %v322_v5, 128  ;;  %vm314_vm3 = vcmp.lt.s32.totalorder %v312_v6, 128  ;;  %vm304_vm4 = vcmp.lt.s32.totalorder %v302_v7, 128  ;;  %vm294_vm5 = vcmp.lt.s32.totalorder %v292_v8, 128  ;;  %s792_s26 = scalar_lea.vmem %s1072_s20, 256  ;;  %p1193_p12 = scmp.ne.s32.totalorder %s1186_s10, 0 }
  0x60   : > { %v614_v10 = vsel %vm324_vm2, 1.0, %v875_v9  ;;  %v613_v11 = vsel %vm314_vm3, 1.0, %v875_v9  ;;  %v612_v18 = vsel %vm304_vm4, 1.0, %v875_v9  ;;  %v611_v19 = vsel %vm294_vm5, 1.0, %v875_v9  ;;  %p793_p3 = scmp.ne.s32.totalorder %s1072_s20, %s792_s26  ;;  %s876_s28 = smov [#allocation8]  }
  0x61   : > { %vm282_vm6 = vcmp.ge.s32.totalorder %v281_v12, 0  ;;  %vm272_vm7 = vcmp.ge.s32.totalorder %v271_v13, 0  ;;  %vm262_vm8 = vcmp.ge.s32.totalorder %v261_v20, 0  ;;  %vm252_vm9 = vcmp.ge.s32.totalorder %v251_v21, 0  ;;  %v338_v39 = vld [vmem:[#allocation2 + $0x20] sm:$0xff]  ;;  %s796_s29 = sshll.u32 %s876_s28, 4  ;;  %s797_s29 = int_to_ptr.vmem [resolvable:$false] %s796_s29 }
  0x62   : > { %279 = vrot.lane.b32.xlu1 %v246_v1, %s871_s12  ;;  %269 = vrot.lane.b32.xlu0 %v246_v1, %s872_s13  ;;  %v610_v26 = vsel %vm282_vm6, 1.0, %v875_v9  ;;  %v609_v27 = vsel %vm272_vm7, 1.0, %v875_v9  ;;  %v608_v33 = vsel %vm262_vm8, 1.0, %v875_v9  ;;  %v607_v34 = vsel %vm252_vm9, 1.0, %v875_v9  ;;  %p794_p7 = pnand %p793_p3, %p1193_p12  ;;  %s798_s19 = scalar_lea.vmem %s797_s29, 512 }
  0x63   : > { %p799_p2 = scmp.lt.s32.totalorder %s1072_s20, %s797_s29  ;;  %p800_p13 = scmp.lt.s32.totalorder %s798_s19, %s792_s26 }
  0x64   : > { %p795_p11 = pneg %p794_p7 }
  0x65   : > { %p801_p0 = por %p800_p13, %p799_p2 }
  0x66   : > { %259 = vrot.lane.b32.xlu1 %v246_v1, %s873_s11  ;;  %249 = vrot.lane.b32.xlu0 %v246_v1, %s874_s14 }
  0x67   : > { %p802_p5 = pnand %p801_p0, %p795_p11 }
  0xcc   : > { %v321_v14 = vpop.permute.xlu0 %320  ;;  %v311_v15 = vpop.permute.xlu1 %310 }
  0xcd   : > { %v328_v16 = vmul.f32 %v614_v10, %v321_v14  ;;  %v318_v17 = vmul.f32 %v613_v11, %v311_v15 }
  0xcf   : > { %329 = vst [vmem:[#allocation2 + $0x8] sm:$0xf] %v328_v16  ;;  %319 = vst [vmem:[#allocation2 + $0x38] sm:$0xf] %v318_v17 }
  0xd0   : > { %v301_v22 = vpop.permute.xlu0 %300  ;;  %v291_v23 = vpop.permute.xlu1 %290 }
  0xd1   : > { %v308_v24 = vmul.f32 %v612_v18, %v301_v22  ;;  %v298_v25 = vmul.f32 %v611_v19, %v291_v23 }
  0xd3   : > { %309 = vst [vmem:[#allocation2 + $0x40] sm:$0xf] %v308_v24  ;;  %299 = vst [vmem:[#allocation2 + $0x28] sm:$0xf] %v298_v25 }
  0xd4   : > { %v280_v28 = vpop.permute.xlu1 %279  ;;  %v270_v29 = vpop.permute.xlu0 %269 }
  0xd5   : > { %v287_v30 = vmul.f32 %v610_v26, %v280_v28  ;;  %v277_v31 = vmul.f32 %v609_v27, %v270_v29 }
  0xd6   : > { %v342_v32 = vld [vmem:[#allocation2 + $0x8] sm:$0xff]  ;;  %v341_v38 = vld [vmem:[#allocation2 + $0x38] sm:$0xff] }
  0xd7   : > { %288 = vst [vmem:[#allocation2 + $0x10] sm:$0xf] %v287_v30  ;;  %278 = vst [vmem:[#allocation2 + $0x18] sm:$0xf] %v277_v31  ;;  %v347_v35 = vpack.c.bf16 %v342_v32, %v342_v32 }
  0xd8   : > { %v260_v36 = vpop.permute.xlu1 %259  ;;  %v250_v37 = vpop.permute.xlu0 %249 }
  0xd9   : > { %665 = vmatprep.subr.msk.bf16.mxu0 %vm365_vm10, %v347_v35  ;;  %v367_v40 = vsel %vm365_vm10, %v347_v35, 0  ;;  %v267_v41 = vmul.f32 %v608_v33, %v260_v36  ;;  %v257_v42 = vmul.f32 %v607_v34, %v250_v37 }
  0xda   : > { %652 = vmatpush3.bf16.msra.mxu0 %v367_v40  ;;  %v340_v43 = vld [vmem:[#allocation2 + $0x40] sm:$0xff]  ;;  %v339_v44 = vld [vmem:[#allocation2 + $0x28] sm:$0xff] }
  0xdb   : > { %268 = vst [vmem:[#allocation2] sm:$0xf] %v267_v41  ;;  %258 = vst [vmem:[#allocation2 + $0x30] sm:$0xf] %v257_v42  ;;  %v346_v45 = vpack.c.bf16 %v341_v38, %v340_v43  ;;  %v345_v46 = vpack.c.bf16 %v339_v44, %v338_v39 }
  0xdd   : > { %653 = vmatprep.subr.bf16.mxu0 %v346_v45 }
  0xde   : > { %654 = vmatpush3.bf16.msra.mxu0 %v346_v45  ;;  %v336_v47 = vld [vmem:[#allocation2 + $0x18] sm:$0xff]  ;;  %v337_v48 = vld [vmem:[#allocation2 + $0x10] sm:$0xff] }
  0xdf   : > { %655 = vmatprep.subr.bf16.mxu0 %v345_v46  ;;  %v344_v49 = vpack.c.bf16 %v337_v48, %v336_v47 }
  0xe2   : > { %656 = vmatpush3.bf16.msra.mxu0 %v345_v46  ;;  %v334_v50 = vld [vmem:[#allocation2 + $0x30] sm:$0xff]  ;;  %v335_v51 = vld [vmem:[#allocation2] sm:$0xff] }
  0xe3   : > { %657 = vmatprep.subr.bf16.mxu0 %v344_v49  ;;  %v343_v52 = vpack.c.bf16 %v335_v51, %v334_v50 }
  0xe6   : > { %658 = vmatpush3.bf16.msra.mxu0 %v344_v49 }
  0xe7   : > { %659 = vmatprep.subr.bf16.mxu0 %v343_v52 }
  0xea   : > { %660 = vmatpush3.bf16.msra.mxu0 %v343_v52 }
  0xed   : > { %662 = vmatmul.mubr.msk.bf16.vlgmr.msra.gmra.mxu0 %vm358_vm1, %v737_v53 }
 0x1ad   : > { %v663_v54 = vpop.f32.mrf.mxu0 }
 0x1af   : > { %v403_v55 = vpop.f32.mrf.mxu0 }
 0x1b1   : > { %v664_v56 = vpop.f32.mrf.mxu0 }
 0x1b2   : > { %v419_v57 = vpack.c.bf16 %v664_v56, %v663_v54 }
 0x1b3   : > { %v406_v58 = vpop.f32.mrf.mxu0 }
 0x1b4   : > { %643 = vst [vmem:[%s1024_s24 + $0x8] sm:$0xff] %v419_v57   ;;  %v418_v59 = vpack.c.bf16 %v406_v58, %v403_v55  ;;  %v440_v60 = vunpack.c.l.bf16 %v419_v57  ;;  %v441_v63 = vunpack.c.h.bf16 %v419_v57 }
 0x1b6   : > { %637 = vst [vmem:[%s1024_s24] sm:$0xff] %v418_v59   ;;  %450 = vadd.xlane.f32.xlu0 %v440_v60  ;;  %v439_v61 = vunpack.c.h.bf16 %v418_v59  ;;  %v438_v62 = vunpack.c.l.bf16 %v418_v59  ;;  %v469_v1 = vmul.f32 %v440_v60, %v440_v60  ;;  %v470_v3 = vmul.f32 %v441_v63, %v441_v63 }
 0x1b8   : > { %448 = vadd.xlane.f32.xlu1 %v439_v61  ;;  %v467_v0 = vmul.f32 %v438_v62, %v438_v62  ;;  %v468_v2 = vmul.f32 %v439_v61, %v439_v61 }
 0x1ba   : > { %452 = vadd.xlane.f32.xlu0 %v441_v63 }
 0x1bc   : > { %471 = vadd.xlane.f32.xlu1 %v467_v0 }
 0x1be   : > { %446 = vadd.xlane.f32.xlu0 %v438_v62 }
 0x1c0   : > { %475 = vadd.xlane.f32.xlu1 %v469_v1 }
 0x1c2   : > { %473 = vadd.xlane.f32.xlu0 %v468_v2 }
 0x1c6   : > { %477 = vadd.xlane.f32.xlu0 %v470_v3 }
 0x1c7   : > { %805 = shalt.err (!%p802_p5)
}
 0x1c8   : > { %s806_s24 = scalar_lea.hbm %s1070_s23, 256  ;;  %s810_s12 = scalar_lea.hbm %s1174_s2, 512 }
 0x1c9   : > { %p807_p10 = scmp.ne.s32.totalorder %s1070_s23, %s806_s24  ;;  %p811_p4 = scmp.lt.s32.totalorder %s1070_s23, %s1174_s2 }
 0x1ca   : > { %p812_p6 = scmp.lt.s32.totalorder %s810_s12, %s806_s24 }
 0x1cb   : > { %p808_p8 = pnand %p807_p10, %p1193_p12 }
 0x1cc   : > { %p813_p9 = por %p812_p6, %p811_p4 }
 0x1cd   : > { %p809_p1 = pneg %p808_p8 }
 0x1cf   : > { %p814_p3 = pnand %p813_p9, %p809_p1 }
 0x1d1   : > { %817 = shalt.err (!%p814_p3)
}
 0x1d2   : > { %s877_s6 = smov 64   ;;  %v444_v4 = vld [vmem:[%s1175_s3 + $0x10] sm:$0xff]  ;;  %vm458_vm11 = vcmask 7168   ;;  %v443_v6 = vld [vmem:[%s1175_s3 + $0x8] sm:$0xff]  ;;  %v445_v9 = vld [vmem:[%s1175_s3 + $0x18] sm:$0xff] }
 0x1d3   : > { %672 = dma.vmem_to_hbm [thread:$0]  (%p1193_p12), %s1072_s20, 256, %s1070_s23, %s488_s21, %s877_s6, %s877_s6, %s874_s14  }
 0x1d4   : > { %v463_v12 = vld [vmem:[%s1176_s4] sm:$0xff]  ;;  %v465_v18 = vld [vmem:[%s1176_s4 + $0x10] sm:$0xff]  ;;  %v464_v21 = vld [vmem:[%s1176_s4 + $0x8] sm:$0xff] }
 0x1d5   : > { %v442_v15 = vld [vmem:[%s1175_s3] sm:$0xff]  ;;  %v466_v25 = vld [vmem:[%s1176_s4 + $0x18] sm:$0xff] }
 0x23f   : > { %v451_v5 = vpop.xlane.xlu0 %450 }
 0x240   : > { %v456_v7 = vadd.f32 %v451_v5, %v444_v4 }
 0x241   : > { %v449_v8 = vpop.xlane.xlu1 %448 }
 0x242   : > { %461 = vst.msk [vmem:[%s1175_s3 + $0x10] sm:$0xff] %vm458_vm11, %v456_v7  ;;  %v455_v10 = vadd.f32 %v449_v8, %v443_v6 }
 0x243   : > { %v453_v11 = vpop.xlane.xlu0 %452 }
 0x244   : > { %460 = vst.msk [vmem:[%s1175_s3 + $0x8] sm:$0xff] %vm458_vm11, %v455_v10  ;;  %v457_v13 = vadd.f32 %v453_v11, %v445_v9 }
 0x245   : > { %v472_v14 = vpop.xlane.xlu1 %471 }
 0x246   : > { %462 = vst.msk [vmem:[%s1175_s3 + $0x18] sm:$0xff] %vm458_vm11, %v457_v13  ;;  %v479_v16 = vadd.f32 %v472_v14, %v463_v12 }
 0x247   : > { %v447_v17 = vpop.xlane.xlu0 %446 }
 0x248   : > { %483 = vst.msk [vmem:[%s1176_s4] sm:$0xff] %vm458_vm11, %v479_v16  ;;  %v454_v19 = vadd.f32 %v447_v17, %v442_v15 }
 0x249   : > { %v476_v20 = vpop.xlane.xlu1 %475 }
 0x24a   : > { %459 = vst.msk [vmem:[%s1175_s3] sm:$0xff] %vm458_vm11, %v454_v19  ;;  %v481_v22 = vadd.f32 %v476_v20, %v465_v18 }
 0x24b   : > { %v474_v23 = vpop.xlane.xlu0 %473 }
 0x24c   : > { %485 = vst.msk [vmem:[%s1176_s4 + $0x10] sm:$0xff] %vm458_vm11, %v481_v22  ;;  %v480_v24 = vadd.f32 %v474_v23, %v464_v21 }
 0x24e   : > { %484 = vst.msk [vmem:[%s1176_s4 + $0x8] sm:$0xff] %vm458_vm11, %v480_v24 }
 0x24f   : > { %v478_v26 = vpop.xlane.xlu0 %477 }
 0x250   : > { %v482_v27 = vadd.f32 %v478_v26, %v466_v25 }
 0x252   : > { %486 = vst.msk [vmem:[%s1176_s4 + $0x18] sm:$0xff] %vm458_vm11, %v482_v27 }
 0x253 PF: > { %s528_s7 = sand.u32 1, %s848_s15   ;;  %p1194_p12 = scmp.ne.s32.totalorder %s1182_s22, 0 }
 0x254   : > { %p1195_p7 = scmp.ge.s32.totalorder %s860_s18, 2  ;;  %s529_s8 = scalar_lea.sflag [#allocation5], %s528_s7 }
 0x256   : > { %p683_p11 = pnand %p1195_p7, %p1194_p12 }
 0x258   : > { %p684_p2 = pneg %p683_p11 }
 0x25a   : > { %843 = dma.done.wait (%p684_p2), %s529_s8, 256  }
 0x25b   : > { %845 = vsyncadd (%p684_p2), %s529_s8, 4294967040  ;;  %p19_p13 = scmp.ge.s32.totalorder %s958_s27, 4   ;;  %s1196_s15 = smov %s852_s16 }
 0x25c   : > { %s1197_s16 = smov %s856_s17  ;;  %s1198_s17 = smov %s975_s9 }
 0x25d   : > { %s1199_s18 = smov %s958_s27  ;;  %21 = sbr.rel (!%p19_p13) target bundleno = 6 (0x6), region = 97 }
 0x262   :  { %534 = vsyncpa [#allocation4], 1 }
 0x263   :  { %536 = vsyncpa [#allocation4 + $0x1], 1 }
 0x264   :  { %537 = vsyncpa [#allocation7], 1 }
 0x265   :  { %538 = vsyncpa [#allocation5], 1 }
 0x266   :  { %540 = vsyncpa [#allocation5 + $0x1], 1 }

</bundles_post_ra>
